<compile_context>
chip_gen: v6e
topology: v6e:2x2x1
jax: 0.10.0
libtpu: 0.0.40
codegen_flags: <defaults>
</compile_context>

<pallas_src>
import functools

import jax
import jax.numpy as jnp
from jax.experimental import pallas as pl
from jax.experimental.pallas import tpu as pltpu


# ----------------------------- Pallas kernels ------------------------------


def _deconv_stats_kernel(x_ref, w_ref, y_ref, stats_ref):
    """One row-tile of the deconv-as-matmul, plus per-lane partial BN stats.

    x_ref:     (TM, Cin)   NHWC-flattened input rows
    w_ref:     (Cin, KN)   KN = kH*kW*Cout_pad (lane-dense)
    y_ref:     (TM, KN)    raw ConvTranspose2d output for this row tile
    stats_ref: (1, 2, KN)  [sum; sum-of-squares] over the TM rows of this tile
    """
    y = jnp.dot(x_ref[...], w_ref[...], preferred_element_type=jnp.float32)
    y_ref[...] = y
    s = jnp.sum(y, axis=0, keepdims=True)        # (1, KN)
    sq = jnp.sum(y * y, axis=0, keepdims=True)   # (1, KN)
    stats_ref[...] = jnp.concatenate([s, sq], axis=0).reshape(stats_ref.shape)


def _norm_relu_kernel(y_ref, scale_ref, shift_ref, o_ref):
    """Fused BatchNorm normalize (precomputed per-lane scale/shift) + ReLU."""
    o_ref[...] = jnp.maximum(y_ref[...] * scale_ref[...] + shift_ref[...], 0.0)


# ------------------------------- wrappers -----------------------------------


def _round_up(x, m):
    return (x + m - 1) // m * m


def _pick_tm(m):
    # ~512-row tiles (amortize per-step overhead, good HBM roofline fraction);
    # for small inputs still produce >= 2 grid steps so both v7x TensorCores
    # get work. Row tiles must be multiples of 8 sublanes.
    if m >= 1024:
        return 512
    return max(8, _round_up((m + 1) // 2, 8))


def _deconv_with_stats(x_flat, w_flat, tm):
    m_pad, cin = x_flat.shape
    kn = w_flat.shape[1]
    g = m_pad // tm
    cost = pl.CostEstimate(
        flops=2 * m_pad * cin * kn + 3 * m_pad * kn,
        transcendentals=0,
        bytes_accessed=4 * (m_pad * cin + cin * kn + m_pad * kn + g * 2 * kn),
    )
    return pl.pallas_call(
        _deconv_stats_kernel,
        out_shape=(
            jax.ShapeDtypeStruct((m_pad, kn), jnp.float32),
            jax.ShapeDtypeStruct((g, 2, kn), jnp.float32),
        ),
        grid_spec=pltpu.PrefetchScalarGridSpec(
            num_scalar_prefetch=0,
            grid=(g,),
            in_specs=[
                pl.BlockSpec((tm, cin), lambda i: (i, 0)),
                pl.BlockSpec((cin, kn), lambda i: (0, 0)),
            ],
            out_specs=[
                pl.BlockSpec((tm, kn), lambda i: (i, 0)),
                pl.BlockSpec((1, 2, kn), lambda i: (i, 0, 0)),
            ],
        ),
        compiler_params=pltpu.CompilerParams(
            dimension_semantics=("parallel",)),
        cost_estimate=cost,
    )(x_flat, w_flat)


def _norm_relu(y_flat, scale, shift, tm):
    m_pad, kn = y_flat.shape
    g = m_pad // tm
    cost = pl.CostEstimate(
        flops=3 * m_pad * kn,
        transcendentals=0,
        bytes_accessed=4 * (2 * m_pad * kn + 2 * kn),
    )
    return pl.pallas_call(
        _norm_relu_kernel,
        out_shape=jax.ShapeDtypeStruct((m_pad, kn), jnp.float32),
        grid_spec=pltpu.PrefetchScalarGridSpec(
            num_scalar_prefetch=0,
            grid=(g,),
            in_specs=[
                pl.BlockSpec((tm, kn), lambda i: (i, 0)),
                pl.BlockSpec((1, kn), lambda i: (0, 0)),
                pl.BlockSpec((1, kn), lambda i: (0, 0)),
            ],
            out_specs=pl.BlockSpec((tm, kn), lambda i: (i, 0)),
        ),
        compiler_params=pltpu.CompilerParams(
            dimension_semantics=("parallel",)),
        cost_estimate=cost,
    )(y_flat, scale, shift)


def deconv2d_bn_forward(x, weight, bias, gamma, beta, *, eps=1e-5):
    """x: (N, Cin, H, W); weight: (Cin, Cout, kH, kW) [PyTorch ConvTranspose2d];
    bias/gamma/beta: (Cout,). Returns (N, Cout, kH*H, kW*W) float32."""
    N, Cin, H, W = x.shape
    _, Cout, kH, kW = weight.shape
    M = N * H * W
    KK = kH * kW

    # Lane-dense lanes: for this module's k=2,s=2 (KK=4) padding Cout to a
    # multiple of 32 makes KN = KK*Cout_pad a multiple of 128.
    cout_pad = _round_up(Cout, max(1, 128 // KK))
    KN = KK * cout_pad

    TM = _pick_tm(M)
    M_pad = _round_up(M, TM)

    # --- flatten: rows = (n,i,j) in NHWC order, lanes = (ki,kj,co) ---
    x_flat = jnp.transpose(x, (0, 2, 3, 1)).reshape(M, Cin).astype(jnp.float32)
    x_flat = jnp.pad(x_flat, ((0, M_pad - M), (0, 0)))

    w_khwc = jnp.transpose(weight, (0, 2, 3, 1)).astype(jnp.float32)  # (Cin,kH,kW,Cout)
    w_khwc = jnp.pad(w_khwc, ((0, 0), (0, 0), (0, 0), (0, cout_pad - Cout)))
    w_flat = w_khwc.reshape(Cin, KN)

    # NOTE: the ConvTranspose2d bias is intentionally dropped — BatchNorm
    # subtracts the per-channel batch mean, so a constant per-channel bias
    # cancels exactly and has no effect on the final output.
    del bias

    # --- pass 1: deconv matmul + per-tile partial BN statistics ---
    y_flat, stats = _deconv_with_stats(x_flat, w_flat, TM)

    # --- tiny reduction of the partial stats (negligible work, plain XLA) ---
    stats = jnp.sum(stats, axis=0)                       # (2, KN)
    stats = stats.reshape(2, KK, cout_pad).sum(axis=1)   # (2, Cout_pad)
    count = jnp.float32(M * KK)                          # elems per channel
    mean = stats[0] / count
    var = stats[1] / count - mean * mean                 # biased var (PyTorch BN)
    inv = jax.lax.rsqrt(var + jnp.float32(eps))

    gamma_p = jnp.pad(gamma.astype(jnp.float32), (0, cout_pad - Cout))
    beta_p = jnp.pad(beta.astype(jnp.float32), (0, cout_pad - Cout))
    scale_c = gamma_p * inv
    shift_c = beta_p - mean * scale_c
    scale = jnp.tile(scale_c, KK).reshape(1, KN)          # matches (ki,kj,co) lanes
    shift = jnp.tile(shift_c, KK).reshape(1, KN)

    # --- pass 2: normalize + ReLU on the same flat layout ---
    out_flat = _norm_relu(y_flat, scale, shift, TM)

    # --- single scatter back to NCHW, once, at the very end ---
    out = out_flat[:M].reshape(N, H, W, kH, kW, cout_pad)[..., :Cout]
    out = jnp.transpose(out, (0, 5, 1, 3, 2, 4)).reshape(N, Cout, H * kH, W * kW)
    return out


# ------------------------------ reference -----------------------------------


def _reference(x, weight, bias, gamma, beta, eps=1e-5):
    N, Cin, H, W = x.shape
    _, Cout, kH, kW = weight.shape
    # transposed conv with stride == kernel (non-overlapping scatter)
    y = jnp.einsum("ncij,cokl->noikjl", x, weight)
    y = y.reshape(N, Cout, H * kH, W * kW) + bias[None, :, None, None]
    mean = jnp.mean(y, axis=(0, 2, 3), keepdims=True)
    var = jnp.mean((y - mean) ** 2, axis=(0, 2, 3), keepdims=True)
    y = (y - mean) / jnp.sqrt(var + eps)
    y = y * gamma[None, :, None, None] + beta[None, :, None, None]
    return jnp.maximum(y, 0.0)


# --------------------------------- main --------------------------------------

if __name__ == "__main__":
    key = jax.random.PRNGKey(0)
    k1, k2, k3, k4, k5 = jax.random.split(key, 5)

    N, Cin, H, W = 2, 4, 16, 16
    Cout, kH, kW = 8, 2, 2

    x = jax.random.normal(k1, (N, Cin, H, W), dtype=jnp.float32)
    weight = 0.1 * jax.random.normal(k2, (Cin, Cout, kH, kW), dtype=jnp.float32)
    bias = 0.1 * jax.random.normal(k3, (Cout,), dtype=jnp.float32)
    gamma = 1.0 + 0.05 * jax.random.normal(k4, (Cout,), dtype=jnp.float32)
    beta = 0.05 * jax.random.normal(k5, (Cout,), dtype=jnp.float32)

    fwd = jax.jit(deconv2d_bn_forward)
    out = fwd(x, weight, bias, gamma, beta)
    out = jax.block_until_ready(out)

    ref = _reference(x, weight, bias, gamma, beta)
    assert out.shape == (N, Cout, H * kH, W * kW), out.shape
    max_err = float(jnp.max(jnp.abs(out - ref)))
    assert max_err < 1e-4, max_err

    print("KERNEL_OK")
</pallas_src>

<mosaic_0001>
module attributes {stable_mosaic.version = 11 : i64} {
  func.func @_deconv_stats_kernel(%arg0: i32, %arg1: memref<256x4xf32, #tpu.memory_space<vmem>>, %arg2: memref<4x128xf32, #tpu.memory_space<vmem>>, %arg3: memref<256x128xf32, #tpu.memory_space<vmem>>, %arg4: memref<1x2x128xf32, #tpu.memory_space<vmem>>) attributes {dimension_semantics = [#tpu.dimension_semantics<parallel>], iteration_bounds = array<i64: 2>, scalar_prefetch = 0 : i64, scratch_operands = 0 : i64, tpu.core_type = #tpu.core_type<tc>, window_params = [{transform_indices = @transform_0, window_bounds = array<i64: 256, 4>}, {pipeline_mode = #tpu.pipeline_mode<synchronous>, transform_indices = @transform_1, window_bounds = array<i64: 4, 128>}, {transform_indices = @transform_2, window_bounds = array<i64: 256, 128>}, {transform_indices = @transform_3, window_bounds = array<i64: 1, 2, 128>}]} {
    %c0 = arith.constant 0 : index
    %c0_0 = arith.constant 0 : index
    %0 = vector.load %arg1[%c0, %c0_0] : memref<256x4xf32, #tpu.memory_space<vmem>>, vector<256x4xf32>
    %c0_1 = arith.constant 0 : index
    %c0_2 = arith.constant 0 : index
    %1 = vector.load %arg2[%c0_1, %c0_2] : memref<4x128xf32, #tpu.memory_space<vmem>>, vector<4x128xf32>
    %cst = arith.constant dense<0.000000e+00> : vector<256x128xf32>
    %2 = tpu.matmul %0, %1, %cst {dimension_numbers = #tpu.dot_dimension_numbers<[1], [0], [0], [1], [0, 0, 1, 1], [], []>} : vector<256x4xf32>, vector<4x128xf32>, vector<256x128xf32> -> vector<256x128xf32>
    %c0_3 = arith.constant 0 : index
    %c0_4 = arith.constant 0 : index
    %3 = vector.load %arg3[%c0_3, %c0_4] : memref<256x128xf32, #tpu.memory_space<vmem>>, vector<256x128xf32>
    tpu.vector_store %arg3[%c0_3, %c0_4], %2 {strides = array<i32>} : memref<256x128xf32, #tpu.memory_space<vmem>>, vector<256x128xf32>,
    %cst_5 = arith.constant dense<0.000000e+00> : vector<128xf32>
    %4 = vector.multi_reduction <add>, %2, %cst_5 [0] : vector<256x128xf32> to vector<128xf32>
    %5 = vector.shape_cast %4 : vector<128xf32> to vector<1x128xf32>
    %6 = arith.mulf %2, %2 : vector<256x128xf32>
    %cst_6 = arith.constant dense<0.000000e+00> : vector<128xf32>
    %7 = vector.multi_reduction <add>, %6, %cst_6 [0] : vector<256x128xf32> to vector<128xf32>
    %8 = vector.shape_cast %7 : vector<128xf32> to vector<1x128xf32>
    %9 = tpu.concatenate %5, %8 in 0 : vector<1x128xf32>, vector<1x128xf32> -> vector<2x128xf32>
    %10 = vector.shape_cast %9 : vector<2x128xf32> to vector<1x2x128xf32>
    %c0_7 = arith.constant 0 : index
    %c0_8 = arith.constant 0 : index
    %c0_9 = arith.constant 0 : index
    %11 = vector.load %arg4[%c0_7, %c0_8, %c0_9] : memref<1x2x128xf32, #tpu.memory_space<vmem>>, vector<1x2x128xf32>
    tpu.vector_store %arg4[%c0_7, %c0_8, %c0_9], %10 {strides = array<i32>} : memref<1x2x128xf32, #tpu.memory_space<vmem>>, vector<1x2x128xf32>,
    return
  }
  func.func @transform_0(%arg0: i32) -> (i32, i32) {
    %c0_i32 = arith.constant 0 : i32
    %c0_i32_0 = arith.constant 0 : i32
    return %arg0, %c0_i32 : i32, i32
  }
  func.func @transform_1(%arg0: i32) -> (i32, i32) {
    %c0_i32 = arith.constant 0 : i32
    %c0_i32_0 = arith.constant 0 : i32
    %c0_i32_1 = arith.constant 0 : i32
    return %c0_i32, %c0_i32_0 : i32, i32
  }
  func.func @transform_2(%arg0: i32) -> (i32, i32) {
    %c0_i32 = arith.constant 0 : i32
    %c0_i32_0 = arith.constant 0 : i32
    return %arg0, %c0_i32 : i32, i32
  }
  func.func @transform_3(%arg0: i32) -> (i32, i32, i32) {
    %c0_i32 = arith.constant 0 : i32
    %c0_i32_0 = arith.constant 0 : i32
    %c0_i32_1 = arith.constant 0 : i32
    return %arg0, %c0_i32, %c0_i32_0 : i32, i32, i32
  }
}

module attributes {stable_mosaic.version = 11 : i64} {
  func.func @_norm_relu_kernel(%arg0: i32, %arg1: memref<256x128xf32, #tpu.memory_space<vmem>>, %arg2: memref<1x128xf32, #tpu.memory_space<vmem>>, %arg3: memref<1x128xf32, #tpu.memory_space<vmem>>, %arg4: memref<256x128xf32, #tpu.memory_space<vmem>>) attributes {dimension_semantics = [#tpu.dimension_semantics<parallel>], iteration_bounds = array<i64: 2>, scalar_prefetch = 0 : i64, scratch_operands = 0 : i64, tpu.core_type = #tpu.core_type<tc>, window_params = [{transform_indices = @transform_0, window_bounds = array<i64: 256, 128>}, {pipeline_mode = #tpu.pipeline_mode<synchronous>, transform_indices = @transform_1, window_bounds = array<i64: 1, 128>}, {pipeline_mode = #tpu.pipeline_mode<synchronous>, transform_indices = @transform_2, window_bounds = array<i64: 1, 128>}, {transform_indices = @transform_3, window_bounds = array<i64: 256, 128>}]} {
    %c0 = arith.constant 0 : index
    %c0_0 = arith.constant 0 : index
    %0 = vector.load %arg1[%c0, %c0_0] : memref<256x128xf32, #tpu.memory_space<vmem>>, vector<256x128xf32>
    %c0_1 = arith.constant 0 : index
    %c0_2 = arith.constant 0 : index
    %1 = vector.load %arg2[%c0_1, %c0_2] : memref<1x128xf32, #tpu.memory_space<vmem>>, vector<1x128xf32>
    %2 = vector.broadcast %1 : vector<1x128xf32> to vector<256x128xf32>
    %3 = arith.mulf %0, %2 : vector<256x128xf32>
    %c0_3 = arith.constant 0 : index
    %c0_4 = arith.constant 0 : index
    %4 = vector.load %arg3[%c0_3, %c0_4] : memref<1x128xf32, #tpu.memory_space<vmem>>, vector<1x128xf32>
    %5 = vector.broadcast %4 : vector<1x128xf32> to vector<256x128xf32>
    %6 = arith.addf %3, %5 : vector<256x128xf32>
    %cst = arith.constant 0.000000e+00 : f32
    %7 = vector.broadcast %cst : f32 to vector<256x128xf32>
    %8 = arith.maximumf %6, %7 : vector<256x128xf32>
    %c0_5 = arith.constant 0 : index
    %c0_6 = arith.constant 0 : index
    %9 = vector.load %arg4[%c0_5, %c0_6] : memref<256x128xf32, #tpu.memory_space<vmem>>, vector<256x128xf32>
    tpu.vector_store %arg4[%c0_5, %c0_6], %8 {strides = array<i32>} : memref<256x128xf32, #tpu.memory_space<vmem>>, vector<256x128xf32>,
    return
  }
  func.func @transform_0(%arg0: i32) -> (i32, i32) {
    %c0_i32 = arith.constant 0 : i32
    %c0_i32_0 = arith.constant 0 : i32
    return %arg0, %c0_i32 : i32, i32
  }
  func.func @transform_1(%arg0: i32) -> (i32, i32) {
    %c0_i32 = arith.constant 0 : i32
    %c0_i32_0 = arith.constant 0 : i32
    %c0_i32_1 = arith.constant 0 : i32
    return %c0_i32, %c0_i32_0 : i32, i32
  }
  func.func @transform_2(%arg0: i32) -> (i32, i32) {
    %c0_i32 = arith.constant 0 : i32
    %c0_i32_0 = arith.constant 0 : i32
    %c0_i32_1 = arith.constant 0 : i32
    return %c0_i32, %c0_i32_0 : i32, i32
  }
  func.func @transform_3(%arg0: i32) -> (i32, i32) {
    %c0_i32 = arith.constant 0 : i32
    %c0_i32_0 = arith.constant 0 : i32
    return %arg0, %c0_i32 : i32, i32
  }
}

</mosaic_0001>

<bundles_post_ra>
// kernel: tile.18
= control target key start
LH: loop header
LB: loop body
LE: loop exit
PB: predicated region body
PF: predicated region fallthrough
CT: control target
= control target key end

     0   :  { %s22_s0 = inlined_call_operand.vmem [shape: f32[32], index: 0, kind: input, shape index: {}]   ;;  %s23_s1 = inlined_call_operand.vmem [shape: f32[4,32], index: 1, kind: output, shape index: {}]  }
   0x1   :  { %v4_v0 = vld [vmem:[%s22_s0] ss:$0 sm:$0xff] }
   0x2   :  { %5 = vst [vmem:[%s23_s1] sm:$0xf] %v4_v0 }

// kernel: tile.19
= control target key start
LH: loop header
LB: loop body
LE: loop exit
PB: predicated region body
PF: predicated region fallthrough
CT: control target
= control target key end

     0   :  { %vm8_vm0 = vcmask 261120   ;;  %s40_s8 = smov 32   ;;  %s41_s9 = smov 64   ;;  %vm14_vm1 = vcmask 1048320   ;;  %vm20_vm2 = vcmask 785920   ;;  %vm26_vm3 = vcmask 523520   ;;  %s58_s0 = inlined_call_operand.vmem [shape: f32[4,32], index: 0, kind: input, shape index: {}]   ;;  %s59_s1 = inlined_call_operand.vmem [shape: f32[1,128], index: 1, kind: output, shape index: {}]  }
   0x1   :  { %v5_v0 = vld [vmem:[%s58_s0] sm:$0xf]  ;;  %s39_s0 = smov 96  }
   0x2   :  { %6 = vst [vmem:[#allocation1] sm:$0xf] %v5_v0 }
   0x9   :  { %v11_v1 = vld [vmem:[#allocation1 + $0x3] sm:$0x1]   ;;  %v23_v2 = vld [vmem:[#allocation1 + $0x1] sm:$0x1]   ;;  %v7_v3 = vld [vmem:[#allocation1] sm:$0x1]  }
   0xa   :  { %12 = vrot.lane.b32.xlu0 %v11_v1, %s39_s0  ;;  %24 = vrot.lane.b32.xlu1 %v23_v2, %s40_s8  ;;  %v17_v4 = vld [vmem:[#allocation1 + $0x2] sm:$0x1]   ;;  %9 = vst.msk [vmem:[#allocation0] sm:$0x1] %vm8_vm0, %v7_v3  }
   0xe   :  { %18 = vrot.lane.b32.xlu0 %v17_v4, %s41_s9 }
  0x7c   :  { %v13_v5 = vpop.permute.xlu0 %12   ;;  %v25_v6 = vpop.permute.xlu1 %24  }
  0x7d   :  { %15 = vst.msk [vmem:[#allocation0] sm:$0x1] %vm14_vm1, %v13_v5  }
  0x80   :  { %v19_v7 = vpop.permute.xlu0 %18  }
  0x81   :  { %21 = vst.msk [vmem:[#allocation0] sm:$0x1] %vm20_vm2, %v19_v7  }
  0x82   :  { %27 = vst.msk [vmem:[#allocation0] sm:$0x1] %vm26_vm3, %v25_v6  }
  0x89   :  { %v32_v8 = vld [vmem:[#allocation0] sm:$0x1] }
  0x8a   :  { %35 = vst [vmem:[%s59_s1] sm:$0x1] %v32_v8 }

// kernel: deconv2d_bn_forward.2
= control target key start
LH: loop header
LB: loop body
LE: loop exit
PB: predicated region body
PF: predicated region fallthrough
CT: control target
= control target key end

     0   :  { %s938_s12 = smov 0   ;;  %s1133_s0 = inlined_call_operand.vmem [shape: f32[512,4], index: 0, kind: input, shape index: {}]   ;;  %s1134_s1 = inlined_call_operand.vmem [shape: f32[4,128], index: 1, kind: input, shape index: {}]   ;;  %s1135_s2 = inlined_call_operand.vmem [shape: f32[512,128], index: 2, kind: output, shape index: {0}]   ;;  %s1136_s3 = inlined_call_operand.vmem [shape: f32[2,2,128], index: 3, kind: output, shape index: {1}]  }
   0x1 LB: > { %s944_s13 = sadd.s32 4294967295, %s916_s12   ;;  %p776_p0 = scmp.ge.s32.totalorder %s916_s12, 1  ;;  %s916_s12 = sphi %s938_s12, %s14_s12  }
   0x2   : > { %p141_p1 = scmp.lt.s32.totalorder %s916_s12, 3 }
   0x4   : > { %p142_p2 = pnand %p776_p0, %p141_p1 }
   0x5   : > { %s777_s16 = sshll.u32 (!%p142_p2), %s944_s13, 5  ;;  %p181_p4 = scmp.lt.s32.totalorder (!%p142_p2), %s944_s13, 1 }
   0x6   : > { %145 = sbr.rel (%p142_p2) target bundleno = 291 (0x123), region = 28  ;;  %p170_p3 = scmp.lt.s32.totalorder (!%p142_p2), %s777_s16, 63 }
   0xb   : > { %v217_v0 = vld [vmem:[%s1134_s1] sm:$0xf]  ;;  %vm315_vm0 = vcmask 1043456   ;;  %s1138_s16 = smov (!%p170_p3, %s777_s16), 63  ;;  %vm218_vm1 = vcmask 31744   ;;  %s1140_s13 = smov (!%p181_p4, %s944_s13), 1 }
   0xc   : > { %850 = vmatprep.subr.msk.mxu0 %vm315_vm0, %v217_v0  ;;  %900 = vmatprep.subr.msk.mxu1 %vm315_vm0, %v217_v0  ;;  %s778_s17 = sshll.u32 %s1138_s16, 3  ;;  %s781_s24 = sshll.u32 %s1140_s13, 1  ;;  %vm682_vm2 = vcmask 1040384  }
   0xd   : > { %851 = vmatpush3.msk.msra.mxu0 %vm315_vm0, %v217_v0  ;;  %901 = vmatpush3.msk.msra.mxu1 %vm315_vm0, %v217_v0  ;;  %s960_s20 = scalar_lea.vmem %s1133_s0, %s778_s17  ;;  %s1031_s23 = scalar_lea.vmem %s1135_s2, %s778_s17 }
   0xe   : > { %v185_v1 = vld [vmem:[%s960_s20] sm:$0xff]  ;;  %v186_v2 = vld [vmem:[%s960_s20 + $0x8] sm:$0xff]  ;;  %v187_v3 = vld [vmem:[%s960_s20 + $0x10] sm:$0xff]  ;;  %s184_s27 = scalar_lea.vmem %s1136_s3, %s781_s24 }
   0xf   : > { %852 = vmatprep.mubr.msk.f32.mxu0 %vm218_vm1, %v185_v1  ;;  %v188_v4 = vld [vmem:[%s960_s20 + $0x18] sm:$0xff]  ;;  %v189_v5 = vld [vmem:[%s960_s20 + $0x20] sm:$0xff]  ;;  %v202_v7 = vld [vmem:[%s960_s20 + $0x88] sm:$0xff] }
  0x10   : > { %853 = vmatmul.mubr.msk.f32.vlgmr.msra.gmra.mxu0 %vm218_vm1, %v186_v2  ;;  %v201_v6 = vld [vmem:[%s960_s20 + $0x80] sm:$0xff]  ;;  %v203_v8 = vld [vmem:[%s960_s20 + $0x90] sm:$0xff]  ;;  %v190_v9 = vld [vmem:[%s960_s20 + $0x28] sm:$0xff] }
  0x11   : > { %855 = vmatprep.mubr.msk.f32.mxu0 %vm218_vm1, %v187_v3  ;;  %876 = vmatprep.mubr.msk.f32.mxu1 %vm218_vm1, %v201_v6  ;;  %v191_v10 = vld [vmem:[%s960_s20 + $0x30] sm:$0xff]  ;;  %v204_v11 = vld [vmem:[%s960_s20 + $0x98] sm:$0xff]  ;;  %v205_v12 = vld [vmem:[%s960_s20 + $0xa0] sm:$0xff] }
  0x12   : > { %877 = vmatmul.mubr.msk.f32.vlgmr.msra.gmra.mxu1 %vm218_vm1, %v202_v7  ;;  %v192_v13 = vld [vmem:[%s960_s20 + $0x38] sm:$0xff]  ;;  %v193_v14 = vld [vmem:[%s960_s20 + $0x40] sm:$0xff]  ;;  %v206_v15 = vld [vmem:[%s960_s20 + $0xa8] sm:$0xff] }
  0x13   : > { %879 = vmatprep.mubr.msk.f32.mxu1 %vm218_vm1, %v203_v8  ;;  %v207_v16 = vld [vmem:[%s960_s20 + $0xb0] sm:$0xff]  ;;  %v194_v17 = vld [vmem:[%s960_s20 + $0x48] sm:$0xff]  ;;  %v208_v19 = vld [vmem:[%s960_s20 + $0xb8] sm:$0xff] }
  0x14   : > { %856 = vmatmul.mubr.msk.f32.gmra.mxu0 %vm218_vm1, %v188_v4  ;;  %v195_v18 = vld [vmem:[%s960_s20 + $0x50] sm:$0xff]  ;;  %v209_v20 = vld [vmem:[%s960_s20 + $0xc0] sm:$0xff]  ;;  %v196_v21 = vld [vmem:[%s960_s20 + $0x58] sm:$0xff] }
  0x15   : > { %858 = vmatprep.mubr.msk.f32.mxu0 %vm218_vm1, %v189_v5  ;;  %v197_v22 = vld [vmem:[%s960_s20 + $0x60] sm:$0xff]  ;;  %v210_v23 = vld [vmem:[%s960_s20 + $0xc8] sm:$0xff]  ;;  %v211_v24 = vld [vmem:[%s960_s20 + $0xd0] sm:$0xff] }
  0x16   : > { %880 = vmatmul.mubr.msk.f32.gmra.mxu1 %vm218_vm1, %v204_v11  ;;  %v198_v25 = vld [vmem:[%s960_s20 + $0x68] sm:$0xff]  ;;  %v199_v26 = vld [vmem:[%s960_s20 + $0x70] sm:$0xff]  ;;  %v212_v27 = vld [vmem:[%s960_s20 + $0xd8] sm:$0xff] }
  0x17   : > { %882 = vmatprep.mubr.msk.f32.mxu1 %vm218_vm1, %v205_v12  ;;  %v213_v28 = vld [vmem:[%s960_s20 + $0xe0] sm:$0xff]  ;;  %v200_v29 = vld [vmem:[%s960_s20 + $0x78] sm:$0xff]  ;;  %v214_v30 = vld [vmem:[%s960_s20 + $0xe8] sm:$0xff] }
  0x18   : > { %859 = vmatmul.mubr.msk.f32.gmra.mxu0 %vm218_vm1, %v190_v9  ;;  %v215_v31 = vld [vmem:[%s960_s20 + $0xf0] sm:$0xff]  ;;  %v216_v32 = vld [vmem:[%s960_s20 + $0xf8] sm:$0xff] }
  0x19   : > { %861 = vmatprep.mubr.msk.f32.mxu0 %vm218_vm1, %v191_v10 }
  0x1a   : > { %883 = vmatmul.mubr.msk.f32.gmra.mxu1 %vm218_vm1, %v206_v15 }
  0x1b   : > { %885 = vmatprep.mubr.msk.f32.mxu1 %vm218_vm1, %v207_v16 }
  0x1c   : > { %862 = vmatmul.mubr.msk.f32.gmra.mxu0 %vm218_vm1, %v192_v13 }
  0x1d   : > { %864 = vmatprep.mubr.msk.f32.mxu0 %vm218_vm1, %v193_v14 }
  0x1e   : > { %886 = vmatmul.mubr.msk.f32.gmra.mxu1 %vm218_vm1, %v208_v19 }
  0x1f   : > { %888 = vmatprep.mubr.msk.f32.mxu1 %vm218_vm1, %v209_v20 }
  0x20   : > { %865 = vmatmul.mubr.msk.f32.gmra.mxu0 %vm218_vm1, %v194_v17 }
  0x21   : > { %867 = vmatprep.mubr.msk.f32.mxu0 %vm218_vm1, %v195_v18 }
  0x22   : > { %889 = vmatmul.mubr.msk.f32.gmra.mxu1 %vm218_vm1, %v210_v23 }
  0x23   : > { %891 = vmatprep.mubr.msk.f32.mxu1 %vm218_vm1, %v211_v24 }
  0x24   : > { %868 = vmatmul.mubr.msk.f32.gmra.mxu0 %vm218_vm1, %v196_v21 }
  0x25   : > { %870 = vmatprep.mubr.msk.f32.mxu0 %vm218_vm1, %v197_v22 }
  0x26   : > { %892 = vmatmul.mubr.msk.f32.gmra.mxu1 %vm218_vm1, %v212_v27 }
  0x27   : > { %894 = vmatprep.mubr.msk.f32.mxu1 %vm218_vm1, %v213_v28 }
  0x28   : > { %871 = vmatmul.mubr.msk.f32.gmra.mxu0 %vm218_vm1, %v198_v25 }
  0x29   : > { %873 = vmatprep.mubr.msk.f32.mxu0 %vm218_vm1, %v199_v26 }
  0x2a   : > { %895 = vmatmul.mubr.msk.f32.gmra.mxu1 %vm218_vm1, %v214_v30 }
  0x2b   : > { %897 = vmatprep.mubr.msk.f32.mxu1 %vm218_vm1, %v215_v31 }
  0x2c   : > { %874 = vmatmul.mubr.msk.f32.gmra.mxu0 %vm218_vm1, %v200_v29 }
  0x2e   : > { %898 = vmatmul.mubr.msk.f32.gmra.mxu1 %vm218_vm1, %v216_v32 }
  0xd0   : > { %v854_v33 = vpop.f32.mrf.mxu0 }
  0xd1   : > { %545 = vst [vmem:[%s1031_s23 + $0x8] sm:$0xff] %v854_v33  ;;  %v614_v37 = vmul.f32 %v854_v33, %v854_v33 }
  0xd2   : > { %v385_v34 = vpop.f32.mrf.mxu0  ;;  %v1036_v39 = vpop.f32.mrf.mxu1 }
  0xd3   : > { %544 = vst [vmem:[%s1031_s23] sm:$0xff] %v385_v34  ;;  %v613_v35 = vmul.f32 %v385_v34, %v385_v34  ;;  %v576_v38 = vadd.f32 %v854_v33, %v385_v34  ;;  %561 = vst [vmem:[%s1031_s23 + $0x88] sm:$0xff] %v1036_v39 }
  0xd4   : > { %v857_v36 = vpop.f32.mrf.mxu0  ;;  %v1041_v44 = vpop.f32.mrf.mxu1 }
  0xd5   : > { %547 = vst [vmem:[%s1031_s23 + $0x18] sm:$0xff] %v857_v36  ;;  %v645_v41 = vadd.f32 %v614_v37, %v613_v35  ;;  %560 = vst [vmem:[%s1031_s23 + $0x80] sm:$0xff] %v1041_v44  ;;  %v616_v46 = vmul.f32 %v857_v36, %v857_v36 }
  0xd6   : > { %v395_v40 = vpop.f32.mrf.mxu0  ;;  %v1046_v49 = vpop.f32.mrf.mxu1 }
  0xd7   : > { %546 = vst [vmem:[%s1031_s23 + $0x10] sm:$0xff] %v395_v40  ;;  %v577_v42 = vadd.f32 %v576_v38, %v395_v40  ;;  %v615_v43 = vmul.f32 %v395_v40, %v395_v40  ;;  %563 = vst [vmem:[%s1031_s23 + $0x98] sm:$0xff] %v1046_v49 }
  0xd8   : > { %v860_v45 = vpop.f32.mrf.mxu0  ;;  %v1051_v54 = vpop.f32.mrf.mxu1 }
  0xd9   : > { %v646_v47 = vadd.f32 %v645_v41, %v615_v43  ;;  %549 = vst [vmem:[%s1031_s23 + $0x28] sm:$0xff] %v860_v45  ;;  %v578_v48 = vadd.f32 %v857_v36, %v577_v42  ;;  %562 = vst [vmem:[%s1031_s23 + $0x90] sm:$0xff] %v1051_v54  ;;  %v618_v56 = vmul.f32 %v860_v45, %v860_v45 }
  0xda   : > { %v405_v50 = vpop.f32.mrf.mxu0  ;;  %v1056_v59 = vpop.f32.mrf.mxu1 }
  0xdb   : > { %548 = vst [vmem:[%s1031_s23 + $0x20] sm:$0xff] %v405_v50  ;;  %v579_v51 = vadd.f32 %v578_v48, %v405_v50  ;;  %v617_v52 = vmul.f32 %v405_v50, %v405_v50  ;;  %v647_v53 = vadd.f32 %v646_v47, %v616_v46  ;;  %565 = vst [vmem:[%s1031_s23 + $0xa8] sm:$0xff] %v1056_v59 }
  0xdc   : > { %v863_v55 = vpop.f32.mrf.mxu0  ;;  %v1061_v0 = vpop.f32.mrf.mxu1  ;;  %v629_v50 = vmul.f32 %v1041_v44, %v1041_v44 }
  0xdd   : > { %v648_v57 = vadd.f32 %v647_v53, %v617_v52  ;;  %551 = vst [vmem:[%s1031_s23 + $0x38] sm:$0xff] %v863_v55  ;;  %v580_v58 = vadd.f32 %v860_v45, %v579_v51  ;;  %564 = vst [vmem:[%s1031_s23 + $0xa0] sm:$0xff] %v1061_v0  ;;  %v620_v2 = vmul.f32 %v863_v55, %v863_v55 }
  0xde   : > { %v415_v60 = vpop.f32.mrf.mxu0  ;;  %v1066_v5 = vpop.f32.mrf.mxu1  ;;  %v630_v52 = vmul.f32 %v1036_v39, %v1036_v39 }
  0xdf   : > { %550 = vst [vmem:[%s1031_s23 + $0x30] sm:$0xff] %v415_v60  ;;  %v581_v61 = vadd.f32 %v580_v58, %v415_v60  ;;  %v619_v62 = vmul.f32 %v415_v60, %v415_v60  ;;  %v649_v63 = vadd.f32 %v648_v57, %v618_v56  ;;  %567 = vst [vmem:[%s1031_s23 + $0xb8] sm:$0xff] %v1066_v5 }
  0xe0   : > { %v866_v1 = vpop.f32.mrf.mxu0  ;;  %v1071_v10 = vpop.f32.mrf.mxu1  ;;  %v631_v57 = vmul.f32 %v1051_v54, %v1051_v54  ;;  %v632_v60 = vmul.f32 %v1046_v49, %v1046_v49 }
  0xe1   : > { %v650_v3 = vadd.f32 %v649_v63, %v619_v62  ;;  %553 = vst [vmem:[%s1031_s23 + $0x48] sm:$0xff] %v866_v1  ;;  %v582_v4 = vadd.f32 %v863_v55, %v581_v61  ;;  %566 = vst [vmem:[%s1031_s23 + $0xb0] sm:$0xff] %v1071_v10  ;;  %v622_v12 = vmul.f32 %v866_v1, %v866_v1 }
  0xe2   : > { %v425_v6 = vpop.f32.mrf.mxu0  ;;  %v1076_v15 = vpop.f32.mrf.mxu1  ;;  %v633_v63 = vmul.f32 %v1061_v0, %v1061_v0 }
  0xe3   : > { %552 = vst [vmem:[%s1031_s23 + $0x40] sm:$0xff] %v425_v6  ;;  %v583_v7 = vadd.f32 %v582_v4, %v425_v6  ;;  %v621_v8 = vmul.f32 %v425_v6, %v425_v6  ;;  %v651_v9 = vadd.f32 %v650_v3, %v620_v2  ;;  %569 = vst [vmem:[%s1031_s23 + $0xc8] sm:$0xff] %v1076_v15 }
  0xe4   : > { %v869_v11 = vpop.f32.mrf.mxu0  ;;  %v505_v20 = vpop.f32.mrf.mxu1  ;;  %v635_v4 = vmul.f32 %v1071_v10, %v1071_v10 }
  0xe5   : > { %v652_v13 = vadd.f32 %v651_v9, %v621_v8  ;;  %555 = vst [vmem:[%s1031_s23 + $0x58] sm:$0xff] %v869_v11  ;;  %v584_v14 = vadd.f32 %v866_v1, %v583_v7  ;;  %568 = vst [vmem:[%s1031_s23 + $0xc0] sm:$0xff] %v505_v20  ;;  %v624_v22 = vmul.f32 %v869_v11, %v869_v11 }
  0xe6   : > { %v435_v16 = vpop.f32.mrf.mxu0  ;;  %v1083_v25 = vpop.f32.mrf.mxu1  ;;  %v637_v9 = vmul.f32 %v505_v20, %v505_v20 }
  0xe7   : > { %554 = vst [vmem:[%s1031_s23 + $0x50] sm:$0xff] %v435_v16  ;;  %v585_v17 = vadd.f32 %v584_v14, %v435_v16  ;;  %v623_v18 = vmul.f32 %v435_v16, %v435_v16  ;;  %v653_v19 = vadd.f32 %v652_v13, %v622_v12  ;;  %571 = vst [vmem:[%s1031_s23 + $0xd8] sm:$0xff] %v1083_v25 }
  0xe8   : > { %v872_v21 = vpop.f32.mrf.mxu0  ;;  %v515_v30 = vpop.f32.mrf.mxu1  ;;  %v638_v12 = vmul.f32 %v1076_v15, %v1076_v15 }
  0xe9   : > { %v654_v23 = vadd.f32 %v653_v19, %v623_v18  ;;  %557 = vst [vmem:[%s1031_s23 + $0x68] sm:$0xff] %v872_v21  ;;  %v586_v24 = vadd.f32 %v869_v11, %v585_v17  ;;  %570 = vst [vmem:[%s1031_s23 + $0xd0] sm:$0xff] %v515_v30  ;;  %v626_v32 = vmul.f32 %v872_v21, %v872_v21 }
  0xea   : > { %v445_v26 = vpop.f32.mrf.mxu0  ;;  %v896_v35 = vpop.f32.mrf.mxu1  ;;  %v639_v16 = vmul.f32 %v515_v30, %v515_v30 }
  0xeb   : > { %556 = vst [vmem:[%s1031_s23 + $0x60] sm:$0xff] %v445_v26  ;;  %v587_v27 = vadd.f32 %v586_v24, %v445_v26  ;;  %v625_v28 = vmul.f32 %v445_v26, %v445_v26  ;;  %v655_v29 = vadd.f32 %v654_v23, %v624_v22  ;;  %573 = vst [vmem:[%s1031_s23 + $0xe8] sm:$0xff] %v896_v35 }
  0xec   : > { %v875_v31 = vpop.f32.mrf.mxu0  ;;  %v525_v41 = vpop.f32.mrf.mxu1  ;;  %v642_v22 = vmul.f32 %v896_v35, %v896_v35 }
  0xed   : > { %v656_v33 = vadd.f32 %v655_v29, %v625_v28  ;;  %559 = vst [vmem:[%s1031_s23 + $0x78] sm:$0xff] %v875_v31  ;;  %v588_v34 = vadd.f32 %v872_v21, %v587_v27  ;;  %572 = vst [vmem:[%s1031_s23 + $0xe0] sm:$0xff] %v525_v41  ;;  %v628_v42 = vmul.f32 %v875_v31, %v875_v31 }
  0xee   : > { %v455_v36 = vpop.f32.mrf.mxu0  ;;  %v899_v46 = vpop.f32.mrf.mxu1  ;;  %v641_v21 = vmul.f32 %v525_v41, %v525_v41 }
  0xef   : > { %558 = vst [vmem:[%s1031_s23 + $0x70] sm:$0xff] %v455_v36  ;;  %v589_v37 = vadd.f32 %v588_v34, %v455_v36  ;;  %v627_v38 = vmul.f32 %v455_v36, %v455_v36  ;;  %v657_v40 = vadd.f32 %v656_v33, %v626_v32  ;;  %575 = vst [vmem:[%s1031_s23 + $0xf8] sm:$0xff] %v899_v46 }
  0xf0   : > { %v535_v51 = vpop.f32.mrf.mxu1  ;;  %v644_v28 = vmul.f32 %v899_v46, %v899_v46 }
  0xf1   : > { %v590_v43 = vadd.f32 %v875_v31, %v589_v37  ;;  %v658_v45 = vadd.f32 %v657_v40, %v627_v38  ;;  %574 = vst [vmem:[%s1031_s23 + $0xf0] sm:$0xff] %v535_v51  ;;  %v643_v27 = vmul.f32 %v535_v51, %v535_v51 }
  0xf3   : > { %v659_v47 = vadd.f32 %v658_v45, %v628_v42  ;;  %v591_v48 = vadd.f32 %v590_v43, %v1041_v44 }
  0xf5   : > { %v660_v53 = vadd.f32 %v659_v47, %v629_v50  ;;  %v592_v55 = vadd.f32 %v1036_v39, %v591_v48  ;;  %v634_v39 = vmul.f32 %v1056_v59, %v1056_v59 }
  0xf7   : > { %v593_v56 = vadd.f32 %v592_v55, %v1051_v54  ;;  %v661_v58 = vadd.f32 %v660_v53, %v630_v52 }
  0xf9   : > { %v662_v61 = vadd.f32 %v661_v58, %v631_v57  ;;  %v594_v44 = vadd.f32 %v1046_v49, %v593_v56  ;;  %v636_v49 = vmul.f32 %v1066_v5, %v1066_v5 }
  0xfb   : > { %v595_v62 = vadd.f32 %v594_v44, %v1061_v0  ;;  %v663_v1 = vadd.f32 %v662_v61, %v632_v60 }
  0xfd   : > { %v664_v2 = vadd.f32 %v663_v1, %v633_v63  ;;  %v596_v3 = vadd.f32 %v1056_v59, %v595_v62 }
  0xff   : > { %v597_v54 = vadd.f32 %v596_v3, %v1071_v10  ;;  %v665_v6 = vadd.f32 %v664_v2, %v634_v39  ;;  %v640_v10 = vmul.f32 %v1083_v25, %v1083_v25 }
 0x101   : > { %v666_v7 = vadd.f32 %v665_v6, %v635_v4  ;;  %v598_v8 = vadd.f32 %v1066_v5, %v597_v54 }
 0x103   : > { %v599_v0 = vadd.f32 %v598_v8, %v505_v20  ;;  %v667_v11 = vadd.f32 %v666_v7, %v636_v49 }
 0x105   : > { %v668_v13 = vadd.f32 %v667_v11, %v637_v9  ;;  %v600_v59 = vadd.f32 %v1076_v15, %v599_v0 }
 0x107   : > { %v601_v14 = vadd.f32 %v600_v59, %v515_v30  ;;  %v669_v17 = vadd.f32 %v668_v13, %v638_v12 }
 0x109   : > { %v670_v18 = vadd.f32 %v669_v17, %v639_v16  ;;  %v602_v19 = vadd.f32 %v1083_v25, %v601_v14 }
 0x10b   : > { %v603_v5 = vadd.f32 %v602_v19, %v525_v41  ;;  %v671_v20 = vadd.f32 %v670_v18, %v640_v10 }
 0x10d   : > { %v672_v23 = vadd.f32 %v671_v20, %v641_v21  ;;  %v604_v24 = vadd.f32 %v896_v35, %v603_v5 }
 0x10f   : > { %v605_v26 = vadd.f32 %v604_v24, %v535_v51  ;;  %v673_v15 = vadd.f32 %v672_v23, %v642_v22 }
 0x111   : > { %v606_v29 = vadd.f32 %v899_v46, %v605_v26  ;;  %v674_v30 = vadd.f32 %v673_v15, %v643_v27 }
 0x113   : > { %v607_v31 = vrot.slane %v606_v29, 4  ;;  %v675_v32 = vadd.f32 %v674_v30, %v644_v28 }
 0x115   : > { %v608_v33 = vadd.f32 %v607_v31, %v606_v29  ;;  %v676_v34 = vrot.slane %v675_v32, 4 }
 0x117   : > { %v609_v36 = vrot.slane %v608_v33, 2  ;;  %v677_v25 = vadd.f32 %v676_v34, %v675_v32 }
 0x119   : > { %v610_v37 = vadd.f32 %v609_v36, %v608_v33  ;;  %v678_v38 = vrot.slane %v677_v25, 2 }
 0x11b   : > { %v611_v40 = vrot.slane %v610_v37, 1  ;;  %v679_v41 = vadd.f32 %v678_v38, %v677_v25 }
 0x11d   : > { %v680_v35 = vrot.slane %v679_v41, 1  ;;  %v612_v42 = vadd.f32 %v611_v40, %v610_v37 }
 0x11f   : > { %v681_v43 = vadd.f32 %v680_v35, %v679_v41 }
 0x121   : > { %v683_v45 = vsel %vm682_vm2, %v612_v42, %v681_v43 }
 0x122   : > { %684 = vst [vmem:[%s184_s27] sm:$0x3] %v683_v45 }
 0x123 PF: > { %s14_s12 = sadd.s32 1, %s916_s12  }
 0x124   : > { %p11_p5 = scmp.ge.s32.totalorder %s14_s12, 4  }
 0x126   :  { %13 = sbr.rel (!%p11_p5) target bundleno = 1 (0x1), region = 70 }

// kernel: deconv2d_bn_forward.3
= control target key start
LH: loop header
LB: loop body
LE: loop exit
PB: predicated region body
PF: predicated region fallthrough
CT: control target
= control target key end

     0   :  { %s453_s12 = smov 0   ;;  %s612_s0 = inlined_call_operand.vmem [shape: f32[512,128], index: 0, kind: input, shape index: {}]   ;;  %s613_s1 = inlined_call_operand.vmem [shape: f32[1,128], index: 1, kind: input, shape index: {}]   ;;  %s614_s2 = inlined_call_operand.vmem [shape: f32[1,128], index: 2, kind: input, shape index: {}]   ;;  %s615_s3 = inlined_call_operand.vmem [shape: f32[512,128], index: 3, kind: output, shape index: {}]  }
   0x1 LB: > { %s404_s13 = sadd.s32 4294967295, %s431_s12   ;;  %p408_p0 = scmp.ge.s32.totalorder %s431_s12, 1  ;;  %s431_s12 = sphi %s453_s12, %s13_s12  }
   0x2   : > { %p138_p1 = scmp.lt.s32.totalorder %s431_s12, 3 }
   0x4   : > { %p139_p2 = pnand %p408_p0, %p138_p1 }
   0x5   : > { %s409_s14 = sshll.u32 (!%p139_p2), %s404_s13, 5 }
   0x6   : > { %142 = sbr.rel (%p139_p2) target bundleno = 44 (0x2c), region = 32  ;;  %p163_p3 = scmp.lt.s32.totalorder (!%p139_p2), %s409_s14, 63 }
   0xb   : > { %s617_s14 = smov (!%p163_p3, %s409_s14), 63  ;;  %v464_v0 = vld [vmem:[%s613_s1] ss:$0 sm:$0xff] }
   0xc   : > { %s410_s15 = sshll.u32 %s617_s14, 3  ;;  %v474_v1 = vld [vmem:[%s614_s2] ss:$0 sm:$0xff] }
   0xd   : > { %s469_s20 = scalar_lea.vmem %s612_s0, %s410_s15  ;;  %s497_s25 = scalar_lea.vmem %s615_s3, %s410_s15 }
   0xe   : > { %v174_v2 = vld [vmem:[%s469_s20] sm:$0xff]  ;;  %v175_v3 = vld [vmem:[%s469_s20 + $0x8] sm:$0xff]  ;;  %v176_v4 = vld [vmem:[%s469_s20 + $0x10] sm:$0xff] }
   0xf   : > { %v213_v5 = vmul.f32 %v464_v0, %v174_v2  ;;  %v214_v6 = vmul.f32 %v464_v0, %v175_v3  ;;  %v215_v7 = vmul.f32 %v464_v0, %v176_v4  ;;  %v177_v8 = vld [vmem:[%s469_s20 + $0x18] sm:$0xff]  ;;  %v178_v9 = vld [vmem:[%s469_s20 + $0x20] sm:$0xff]  ;;  %v179_v10 = vld [vmem:[%s469_s20 + $0x28] sm:$0xff] }
  0x10   : > { %v216_v11 = vmul.f32 %v464_v0, %v177_v8  ;;  %v217_v12 = vmul.f32 %v464_v0, %v178_v9  ;;  %v218_v13 = vmul.f32 %v464_v0, %v179_v10  ;;  %v180_v14 = vld [vmem:[%s469_s20 + $0x30] sm:$0xff]  ;;  %v181_v15 = vld [vmem:[%s469_s20 + $0x38] sm:$0xff]  ;;  %v182_v24 = vld [vmem:[%s469_s20 + $0x40] sm:$0xff] }
  0x11   : > { %v252_v16 = vadd.f32 %v474_v1, %v213_v5  ;;  %v253_v17 = vadd.f32 %v474_v1, %v214_v6  ;;  %v254_v18 = vadd.f32 %v474_v1, %v215_v7  ;;  %v219_v19 = vmul.f32 %v464_v0, %v180_v14  ;;  %v183_v25 = vld [vmem:[%s469_s20 + $0x48] sm:$0xff]  ;;  %v184_v26 = vld [vmem:[%s469_s20 + $0x50] sm:$0xff]  ;;  %v185_v31 = vld [vmem:[%s469_s20 + $0x58] sm:$0xff] }
  0x12   : > { %v255_v20 = vadd.f32 %v474_v1, %v216_v11  ;;  %v256_v21 = vadd.f32 %v474_v1, %v217_v12  ;;  %v257_v22 = vadd.f32 %v474_v1, %v218_v13  ;;  %v220_v23 = vmul.f32 %v464_v0, %v181_v15  ;;  %v186_v32 = vld [vmem:[%s469_s20 + $0x60] sm:$0xff]  ;;  %v187_v33 = vld [vmem:[%s469_s20 + $0x68] sm:$0xff]  ;;  %v188_v38 = vld [vmem:[%s469_s20 + $0x70] sm:$0xff] }
  0x13   : > { %v284_v27 = vmax.f32 %v252_v16, 0.0  ;;  %v285_v28 = vmax.f32 %v253_v17, 0.0  ;;  %v286_v29 = vmax.f32 %v254_v18, 0.0  ;;  %v258_v30 = vadd.f32 %v474_v1, %v219_v19  ;;  %v189_v43 = vld [vmem:[%s469_s20 + $0x78] sm:$0xff]  ;;  %v190_v56 = vld [vmem:[%s469_s20 + $0x80] sm:$0xff]  ;;  %v191_v57 = vld [vmem:[%s469_s20 + $0x88] sm:$0xff] }
  0x14   : > { %v287_v34 = vmax.f32 %v255_v20, 0.0  ;;  %v288_v35 = vmax.f32 %v256_v21, 0.0  ;;  %v289_v36 = vmax.f32 %v257_v22, 0.0  ;;  %v259_v37 = vadd.f32 %v474_v1, %v220_v23  ;;  %v192_v58 = vld [vmem:[%s469_s20 + $0x90] sm:$0xff]  ;;  %v193_v63 = vld [vmem:[%s469_s20 + $0x98] sm:$0xff]  ;;  %v194_v2 = vld [vmem:[%s469_s20 + $0xa0] sm:$0xff] }
  0x15   : > { %316 = vst [vmem:[%s497_s25] sm:$0xff] %v284_v27  ;;  %317 = vst [vmem:[%s497_s25 + $0x8] sm:$0xff] %v285_v28  ;;  %v290_v39 = vmax.f32 %v258_v30, 0.0  ;;  %v221_v40 = vmul.f32 %v464_v0, %v182_v24  ;;  %v222_v41 = vmul.f32 %v464_v0, %v183_v25  ;;  %v223_v42 = vmul.f32 %v464_v0, %v184_v26  ;;  %v195_v3 = vld [vmem:[%s469_s20 + $0xa8] sm:$0xff]  ;;  %v196_v8 = vld [vmem:[%s469_s20 + $0xb0] sm:$0xff] }
  0x16   : > { %318 = vst [vmem:[%s497_s25 + $0x10] sm:$0xff] %v286_v29  ;;  %319 = vst [vmem:[%s497_s25 + $0x18] sm:$0xff] %v287_v34  ;;  %v291_v44 = vmax.f32 %v259_v37, 0.0  ;;  %v224_v45 = vmul.f32 %v464_v0, %v185_v31  ;;  %v225_v46 = vmul.f32 %v464_v0, %v186_v32  ;;  %v226_v47 = vmul.f32 %v464_v0, %v187_v33  ;;  %v197_v13 = vld [vmem:[%s469_s20 + $0xb8] sm:$0xff]  ;;  %v198_v26 = vld [vmem:[%s469_s20 + $0xc0] sm:$0xff] }
  0x17   : > { %320 = vst [vmem:[%s497_s25 + $0x20] sm:$0xff] %v288_v35  ;;  %321 = vst [vmem:[%s497_s25 + $0x28] sm:$0xff] %v289_v36  ;;  %v260_v48 = vadd.f32 %v474_v1, %v221_v40  ;;  %v261_v49 = vadd.f32 %v474_v1, %v222_v41  ;;  %v262_v50 = vadd.f32 %v474_v1, %v223_v42  ;;  %v199_v27 = vld [vmem:[%s469_s20 + $0xc8] sm:$0xff]  ;;  %v200_v28 = vld [vmem:[%s469_s20 + $0xd0] sm:$0xff] }
  0x18   : > { %322 = vst [vmem:[%s497_s25 + $0x30] sm:$0xff] %v290_v39  ;;  %v227_v51 = vmul.f32 %v464_v0, %v188_v38  ;;  %323 = vst [vmem:[%s497_s25 + $0x38] sm:$0xff] %v291_v44  ;;  %v263_v52 = vadd.f32 %v474_v1, %v224_v45  ;;  %v264_v53 = vadd.f32 %v474_v1, %v225_v46  ;;  %v201_v33 = vld [vmem:[%s469_s20 + $0xd8] sm:$0xff]  ;;  %v202_v34 = vld [vmem:[%s469_s20 + $0xe0] sm:$0xff] }
  0x19   : > { %v265_v54 = vadd.f32 %v474_v1, %v226_v47  ;;  %v228_v55 = vmul.f32 %v464_v0, %v189_v43  ;;  %v292_v59 = vmax.f32 %v260_v48, 0.0  ;;  %v293_v60 = vmax.f32 %v261_v49, 0.0  ;;  %v203_v35 = vld [vmem:[%s469_s20 + $0xe8] sm:$0xff]  ;;  %v204_v40 = vld [vmem:[%s469_s20 + $0xf0] sm:$0xff]  ;;  %v205_v45 = vld [vmem:[%s469_s20 + $0xf8] sm:$0xff] }
  0x1a   : > { %v294_v61 = vmax.f32 %v262_v50, 0.0  ;;  %v266_v62 = vadd.f32 %v474_v1, %v227_v51  ;;  %v295_v4 = vmax.f32 %v263_v52, 0.0  ;;  %v296_v5 = vmax.f32 %v264_v53, 0.0 }
  0x1b   : > { %v297_v6 = vmax.f32 %v265_v54, 0.0  ;;  %v267_v7 = vadd.f32 %v474_v1, %v228_v55  ;;  %324 = vst [vmem:[%s497_s25 + $0x40] sm:$0xff] %v292_v59  ;;  %325 = vst [vmem:[%s497_s25 + $0x48] sm:$0xff] %v293_v60  ;;  %v229_v10 = vmul.f32 %v464_v0, %v190_v56  ;;  %v230_v11 = vmul.f32 %v464_v0, %v191_v57 }
  0x1c   : > { %326 = vst [vmem:[%s497_s25 + $0x50] sm:$0xff] %v294_v61  ;;  %v298_v9 = vmax.f32 %v266_v62, 0.0  ;;  %v231_v12 = vmul.f32 %v464_v0, %v192_v58  ;;  %327 = vst [vmem:[%s497_s25 + $0x58] sm:$0xff] %v295_v4  ;;  %v232_v15 = vmul.f32 %v464_v0, %v193_v63  ;;  %v233_v16 = vmul.f32 %v464_v0, %v194_v2 }
  0x1d   : > { %328 = vst [vmem:[%s497_s25 + $0x60] sm:$0xff] %v296_v5  ;;  %329 = vst [vmem:[%s497_s25 + $0x68] sm:$0xff] %v297_v6  ;;  %v299_v14 = vmax.f32 %v267_v7, 0.0  ;;  %v234_v17 = vmul.f32 %v464_v0, %v195_v3  ;;  %v268_v18 = vadd.f32 %v474_v1, %v229_v10  ;;  %v269_v19 = vadd.f32 %v474_v1, %v230_v11 }
  0x1e   : > { %330 = vst [vmem:[%s497_s25 + $0x70] sm:$0xff] %v298_v9  ;;  %v270_v20 = vadd.f32 %v474_v1, %v231_v12  ;;  %v235_v21 = vmul.f32 %v464_v0, %v196_v8  ;;  %v271_v22 = vadd.f32 %v474_v1, %v232_v15  ;;  %v272_v23 = vadd.f32 %v474_v1, %v233_v16 }
  0x1f   : > { %331 = vst [vmem:[%s497_s25 + $0x78] sm:$0xff] %v299_v14  ;;  %v273_v24 = vadd.f32 %v474_v1, %v234_v17  ;;  %v236_v25 = vmul.f32 %v464_v0, %v197_v13  ;;  %v300_v29 = vmax.f32 %v268_v18, 0.0  ;;  %v301_v30 = vmax.f32 %v269_v19, 0.0 }
  0x20   : > { %v302_v31 = vmax.f32 %v270_v20, 0.0  ;;  %v274_v32 = vadd.f32 %v474_v1, %v235_v21  ;;  %v303_v36 = vmax.f32 %v271_v22, 0.0  ;;  %v304_v37 = vmax.f32 %v272_v23, 0.0 }
  0x21   : > { %v305_v38 = vmax.f32 %v273_v24, 0.0  ;;  %v275_v39 = vadd.f32 %v474_v1, %v236_v25  ;;  %332 = vst [vmem:[%s497_s25 + $0x80] sm:$0xff] %v300_v29  ;;  %333 = vst [vmem:[%s497_s25 + $0x88] sm:$0xff] %v301_v30  ;;  %v237_v42 = vmul.f32 %v464_v0, %v198_v26  ;;  %v238_v43 = vmul.f32 %v464_v0, %v199_v27 }
  0x22   : > { %334 = vst [vmem:[%s497_s25 + $0x90] sm:$0xff] %v302_v31  ;;  %v306_v41 = vmax.f32 %v274_v32, 0.0  ;;  %v239_v44 = vmul.f32 %v464_v0, %v200_v28  ;;  %335 = vst [vmem:[%s497_s25 + $0x98] sm:$0xff] %v303_v36  ;;  %v240_v47 = vmul.f32 %v464_v0, %v201_v33  ;;  %v241_v48 = vmul.f32 %v464_v0, %v202_v34 }
  0x23   : > { %336 = vst [vmem:[%s497_s25 + $0xa0] sm:$0xff] %v304_v37  ;;  %337 = vst [vmem:[%s497_s25 + $0xa8] sm:$0xff] %v305_v38  ;;  %v307_v46 = vmax.f32 %v275_v39, 0.0  ;;  %v242_v49 = vmul.f32 %v464_v0, %v203_v35  ;;  %v276_v50 = vadd.f32 %v474_v1, %v237_v42  ;;  %v277_v51 = vadd.f32 %v474_v1, %v238_v43 }
  0x24   : > { %338 = vst [vmem:[%s497_s25 + $0xb0] sm:$0xff] %v306_v41  ;;  %v278_v52 = vadd.f32 %v474_v1, %v239_v44  ;;  %v243_v53 = vmul.f32 %v464_v0, %v204_v40  ;;  %v279_v54 = vadd.f32 %v474_v1, %v240_v47  ;;  %v280_v55 = vadd.f32 %v474_v1, %v241_v48 }
  0x25   : > { %339 = vst [vmem:[%s497_s25 + $0xb8] sm:$0xff] %v307_v46  ;;  %v281_v56 = vadd.f32 %v474_v1, %v242_v49  ;;  %v244_v57 = vmul.f32 %v464_v0, %v205_v45  ;;  %v308_v58 = vmax.f32 %v276_v50, 0.0  ;;  %v309_v59 = vmax.f32 %v277_v51, 0.0 }
  0x26   : > { %v310_v60 = vmax.f32 %v278_v52, 0.0  ;;  %v282_v61 = vadd.f32 %v474_v1, %v243_v53  ;;  %v311_v62 = vmax.f32 %v279_v54, 0.0  ;;  %v312_v63 = vmax.f32 %v280_v55, 0.0 }
  0x27   : > { %v313_v2 = vmax.f32 %v281_v56, 0.0  ;;  %v283_v3 = vadd.f32 %v474_v1, %v244_v57  ;;  %340 = vst [vmem:[%s497_s25 + $0xc0] sm:$0xff] %v308_v58  ;;  %341 = vst [vmem:[%s497_s25 + $0xc8] sm:$0xff] %v309_v59 }
  0x28   : > { %342 = vst [vmem:[%s497_s25 + $0xd0] sm:$0xff] %v310_v60  ;;  %v314_v4 = vmax.f32 %v282_v61, 0.0  ;;  %343 = vst [vmem:[%s497_s25 + $0xd8] sm:$0xff] %v311_v62 }
  0x29   : > { %344 = vst [vmem:[%s497_s25 + $0xe0] sm:$0xff] %v312_v63  ;;  %345 = vst [vmem:[%s497_s25 + $0xe8] sm:$0xff] %v313_v2  ;;  %v315_v0 = vmax.f32 %v283_v3, 0.0 }
  0x2a   : > { %346 = vst [vmem:[%s497_s25 + $0xf0] sm:$0xff] %v314_v4 }
  0x2b   : > { %347 = vst [vmem:[%s497_s25 + $0xf8] sm:$0xff] %v315_v0 }
  0x2c PF: > { %s13_s12 = sadd.s32 1, %s431_s12  }
  0x2d   : > { %p10_p4 = scmp.ge.s32.totalorder %s13_s12, 4  }
  0x2f   :  { %12 = sbr.rel (!%p10_p4) target bundleno = 1 (0x1), region = 62 }

</bundles_post_ra>
